<compile_context>
chip_gen: v6e
topology: v6e:2x2x1
jax: 0.10.0
libtpu: 0.0.40
codegen_flags: <defaults>
</compile_context>

<pallas_src>
import functools
import warnings

import jax
import jax.numpy as jnp
from jax.experimental import pallas as pl
from jax.experimental.pallas import tpu as pltpu


def _cdiv(a, b):
    return (a + b - 1) // b


def _layernorm_kernel(x_ref, w_ref, b_ref, o_ref, *, eps, pdtype, affine_in_f32):
    # PyTorch reference (TF-style LN, eps inside the sqrt):
    #   x_f32 = x.float()
    #   u = mean(x_f32, -1); s = mean((x_f32 - u)^2, -1)     (biased variance)
    #   xn = (x_f32 - u) / sqrt(s + eps)
    #   out = weight * xn.to(pdtype) + bias
    #
    # NOTE: on a ragged last grid block the padded rows contain stale VMEM and
    # their statistics are garbage; every reduction here is strictly per-row
    # and Pallas clips the write of those rows, so results are correct.
    # Do NOT add any cross-row reduction to this kernel.
    x = x_ref[...].astype(jnp.float32)
    u = jnp.mean(x, axis=-1, keepdims=True)
    xc = x - u
    s = jnp.mean(xc * xc, axis=-1, keepdims=True)
    xn_f32 = xc * jax.lax.rsqrt(s + eps)          # rsqrt -> EUP slot (free-ish)
    if affine_in_f32:
        # v5e-friendly path (v5e has no bf16 VPU): keep the affine in f32 and
        # cast once at the store.  One fewer rounding step than PyTorch.
        out = (w_ref[...].astype(jnp.float32) * xn_f32
               + b_ref[...].astype(jnp.float32))
        o_ref[...] = out.astype(o_ref.dtype)
    else:
        # Bit-match the PyTorch forward: cast the normalized value back to the
        # *input* dtype (x.to(pdtype)), then affine in the promoted
        # params/output dtype.  For all-f32 the double cast is a no-op.
        xn = xn_f32.astype(pdtype).astype(o_ref.dtype)
        o_ref[...] = w_ref[...] * xn + b_ref[...]


def _pick_row_block(rows, hidden, in_itemsize, out_itemsize, *,
                    max_rb, min_steps, even_steps):
    """Pick a row tile that amortizes per-step overhead but fits scoped VMEM.

    Per-tile-row VMEM bytes:
      2 * in_itemsize   double-buffered input block
      2 * out_itemsize  double-buffered output block
      + in-kernel f32 intermediates (x_f32 / xc): ~8 B/elem for sub-32-bit
        inputs, ~4 B/elem for f32 inputs (the loaded tile is already f32).
    """
    # Sub-32-bit dtypes pack along sublanes: 8 rows f32, 16 bf16, 32 int8/fp8.
    pack = max(8, 32 // max(1, in_itemsize))
    f32_temps = 8 if in_itemsize < 4 else 4
    per_row_bytes = hidden * (2 * in_itemsize + 2 * out_itemsize + f32_temps)
    budget = 16 * 1024 * 1024
    rb = min(int(budget // max(1, per_row_bytes)), max_rb)
    rb = max(pack, (rb // pack) * pack)

    rows_up = _cdiv(rows, pack) * pack
    rb = min(rb, rows_up)

    # Don't shrink tiles below ~256 rows (per-step overhead ~0.35 us) or below
    # the sublane packing.
    floor_rb = max(pack, min(256, rb))

    # Target >= min_steps grid steps so the auto-pipeline overlaps the DMA of
    # step i+1 / writeback of step i-1 with compute of step i, and both v7x
    # TensorCores get several tiles each.
    if rows_up > floor_rb:
        rb_target = max(pack, ((rows_up // min_steps) // pack) * pack)
        rb = min(rb, max(floor_rb, rb_target))

    # v7x: prefer an even number of grid steps so the two TensorCores get
    # equal work under dimension_semantics=("parallel",).
    steps = _cdiv(rows, rb)
    if even_steps and steps > 1 and steps % 2 == 1:
        rb_even = min(rb, max(pack, _cdiv(_cdiv(rows_up, steps + 1), pack) * pack))
        if _cdiv(rows, rb_even) % 2 == 0:
            rb = rb_even

    return max(pack, int(rb))


def _vmem_capacity_bytes():
    try:
        return int(pltpu.get_tpu_info().vmem_capacity_bytes)
    except Exception:
        # Fall back to the v5e/v6e figure; the limit is still clamped to 3/4
        # of whatever we assume, so this is safe.
        return 128 * 1024 * 1024


def layernorm_pallas(x, weight, bias, eps=1e-12, *, row_block=None,
                     affine_in_f32=False, input_buffers=2):
    """LayerNorm over the last axis of `x` (arbitrary leading dims)."""
    orig_shape = x.shape
    hidden = orig_shape[-1]
    if hidden % 128 != 0:
        # Non-lane-dense output blocks compile to masked vst.msk partial
        # stores (measured up to ~4.5x slower store path).  Pad the feature
        # dim model-side (or pack several rows per 128-lane slab) for
        # production shapes.
        warnings.warn(
            f"layernorm_pallas: hidden={hidden} is not a multiple of 128; "
            "expect masked (slow) vector stores on TPU.")

    x2 = x.reshape(-1, hidden)
    rows = x2.shape[0]
    in_itemsize = jnp.dtype(x.dtype).itemsize

    # Output/affine dtype follows PyTorch promotion of
    # `weight * x.to(pdtype) + bias`; widening the params to it is lossless.
    out_dtype = jnp.result_type(x.dtype, weight.dtype, bias.dtype)
    out_itemsize = jnp.dtype(out_dtype).itemsize

    # Per-generation limits: v7x has only 64 MiB VMEM per TensorCore -> keep
    # tiles smaller, ask for more (even) grid steps, and leave VMEM headroom.
    vmem_cap = _vmem_capacity_bytes()
    small_vmem = vmem_cap < 100 * 1024 * 1024          # v7x-class
    vmem_limit = int(min(64 * 1024 * 1024, (vmem_cap * 3) // 4))

    if row_block is None:
        row_block = _pick_row_block(
            rows, hidden, in_itemsize, out_itemsize,
            max_rb=512 if small_vmem else 1024,
            min_steps=8 if small_vmem else 4,
            even_steps=small_vmem)

    w2 = weight.astype(out_dtype).reshape(1, hidden)
    b2 = bias.astype(out_dtype).reshape(1, hidden)

    kernel = functools.partial(
        _layernorm_kernel, eps=eps, pdtype=x.dtype, affine_in_f32=affine_in_f32)

    # Optional deeper pipelining on the streaming input (one extra input tile
    # of VMEM); only enable where profiling shows the input DMA exposed and
    # the VMEM budget (esp. v7x) allows it.
    x_spec_kwargs = {}
    if input_buffers > 2:
        x_spec_kwargs["pipeline_mode"] = pl.Buffered(input_buffers)
    x_spec = pl.BlockSpec((row_block, hidden), lambda i: (i, 0), **x_spec_kwargs)

    # weight/bias use a constant index_map, so their (1, hidden) blocks stay
    # resident in VMEM across grid steps (no per-step re-DMA).
    out = pl.pallas_call(
        kernel,
        out_shape=jax.ShapeDtypeStruct((rows, hidden), out_dtype),
        grid_spec=pltpu.PrefetchScalarGridSpec(
            num_scalar_prefetch=0,
            grid=(pl.cdiv(rows, row_block),),
            in_specs=[
                x_spec,
                pl.BlockSpec((1, hidden), lambda i: (0, 0)),
                pl.BlockSpec((1, hidden), lambda i: (0, 0)),
            ],
            out_specs=pl.BlockSpec((row_block, hidden), lambda i: (i, 0)),
        ),
        compiler_params=pltpu.CompilerParams(
            dimension_semantics=("parallel",),
            vmem_limit_bytes=vmem_limit,
        ),
    )(x2, w2, b2)

    return out.reshape(orig_shape)


if __name__ == "__main__":
    key = jax.random.PRNGKey(0)
    batch, seq, hidden = 2, 8, 128   # lane-dense hidden (multiple of 128)

    # Deterministic parameter init (module __init__: weight=ones, bias=zeros).
    weight = jnp.ones((hidden,), dtype=jnp.float32)
    bias = jnp.zeros((hidden,), dtype=jnp.float32)

    x = jax.random.normal(key, (batch, seq, hidden), dtype=jnp.float32)

    out = layernorm_pallas(x, weight, bias, eps=1e-12)
    out = jax.block_until_ready(out)

    # Pure-JAX reference (same math as the PyTorch forward).
    xf = x.astype(jnp.float32)
    u = jnp.mean(xf, axis=-1, keepdims=True)
    s = jnp.mean((xf - u) ** 2, axis=-1, keepdims=True)
    ref = weight * ((xf - u) / jnp.sqrt(s + 1e-12)).astype(x.dtype) + bias

    assert out.shape == x.shape
    assert out.dtype == ref.dtype
    # rsqrt vs 1/sqrt differ at ulp level; 1e-5 tolerances cover it.
    assert jnp.allclose(out, ref, atol=1e-5, rtol=1e-5)

    print("KERNEL_OK")
</pallas_src>

<mosaic_0001>
module attributes {stable_mosaic.version = 11 : i64} {
  func.func @_layernorm_kernel(%arg0: i32, %arg1: memref<16x128xf32, #tpu.memory_space<vmem>>, %arg2: memref<1x128xf32, #tpu.memory_space<vmem>>, %arg3: memref<1x128xf32, #tpu.memory_space<vmem>>, %arg4: memref<16x128xf32, #tpu.memory_space<vmem>>) attributes {dimension_semantics = [#tpu.dimension_semantics<parallel>], iteration_bounds = array<i64: 1>, scalar_prefetch = 0 : i64, scratch_operands = 0 : i64, tpu.core_type = #tpu.core_type<tc>, window_params = [{transform_indices = @transform_0, window_bounds = array<i64: 16, 128>}, {pipeline_mode = #tpu.pipeline_mode<synchronous>, transform_indices = @transform_1, window_bounds = array<i64: 1, 128>}, {pipeline_mode = #tpu.pipeline_mode<synchronous>, transform_indices = @transform_2, window_bounds = array<i64: 1, 128>}, {transform_indices = @transform_3, window_bounds = array<i64: 16, 128>}]} {
    %c0 = arith.constant 0 : index
    %c0_0 = arith.constant 0 : index
    %0 = vector.load %arg1[%c0, %c0_0] : memref<16x128xf32, #tpu.memory_space<vmem>>, vector<16x128xf32>
    %cst = arith.constant dense<0.000000e+00> : vector<16xf32>
    %1 = vector.multi_reduction <add>, %0, %cst [1] : vector<16x128xf32> to vector<16xf32>
    %2 = vector.shape_cast %1 : vector<16xf32> to vector<16x1xf32>
    %cst_1 = arith.constant 1.280000e+02 : f32
    %3 = vector.broadcast %cst_1 : f32 to vector<16x1xf32>
    %4 = arith.divf %2, %3 : vector<16x1xf32>
    %5 = vector.broadcast %4 : vector<16x1xf32> to vector<16x128xf32>
    %6 = arith.subf %0, %5 : vector<16x128xf32>
    %7 = arith.mulf %6, %6 : vector<16x128xf32>
    %cst_2 = arith.constant dense<0.000000e+00> : vector<16xf32>
    %8 = vector.multi_reduction <add>, %7, %cst_2 [1] : vector<16x128xf32> to vector<16xf32>
    %9 = vector.shape_cast %8 : vector<16xf32> to vector<16x1xf32>
    %cst_3 = arith.constant 1.280000e+02 : f32
    %10 = vector.broadcast %cst_3 : f32 to vector<16x1xf32>
    %11 = arith.divf %9, %10 : vector<16x1xf32>
    %cst_4 = arith.constant 9.99999996E-13 : f32
    %12 = vector.broadcast %cst_4 : f32 to vector<16x1xf32>
    %13 = arith.addf %11, %12 : vector<16x1xf32>
    %14 = math.rsqrt %13 : vector<16x1xf32>
    %15 = vector.broadcast %14 : vector<16x1xf32> to vector<16x128xf32>
    %16 = arith.mulf %6, %15 : vector<16x128xf32>
    %c0_5 = arith.constant 0 : index
    %c0_6 = arith.constant 0 : index
    %17 = vector.load %arg2[%c0_5, %c0_6] : memref<1x128xf32, #tpu.memory_space<vmem>>, vector<1x128xf32>
    %18 = vector.broadcast %17 : vector<1x128xf32> to vector<16x128xf32>
    %19 = arith.mulf %18, %16 : vector<16x128xf32>
    %c0_7 = arith.constant 0 : index
    %c0_8 = arith.constant 0 : index
    %20 = vector.load %arg3[%c0_7, %c0_8] : memref<1x128xf32, #tpu.memory_space<vmem>>, vector<1x128xf32>
    %21 = vector.broadcast %20 : vector<1x128xf32> to vector<16x128xf32>
    %22 = arith.addf %19, %21 : vector<16x128xf32>
    %c0_9 = arith.constant 0 : index
    %c0_10 = arith.constant 0 : index
    %23 = vector.load %arg4[%c0_9, %c0_10] : memref<16x128xf32, #tpu.memory_space<vmem>>, vector<16x128xf32>
    tpu.vector_store %arg4[%c0_9, %c0_10], %22 {strides = array<i32>} : memref<16x128xf32, #tpu.memory_space<vmem>>, vector<16x128xf32>,
    return
  }
  func.func @transform_0(%arg0: i32) -> (i32, i32) {
    %c0_i32 = arith.constant 0 : i32
    %c0_i32_0 = arith.constant 0 : i32
    return %arg0, %c0_i32 : i32, i32
  }
  func.func @transform_1(%arg0: i32) -> (i32, i32) {
    %c0_i32 = arith.constant 0 : i32
    %c0_i32_0 = arith.constant 0 : i32
    %c0_i32_1 = arith.constant 0 : i32
    return %c0_i32, %c0_i32_0 : i32, i32
  }
  func.func @transform_2(%arg0: i32) -> (i32, i32) {
    %c0_i32 = arith.constant 0 : i32
    %c0_i32_0 = arith.constant 0 : i32
    %c0_i32_1 = arith.constant 0 : i32
    return %c0_i32, %c0_i32_0 : i32, i32
  }
  func.func @transform_3(%arg0: i32) -> (i32, i32) {
    %c0_i32 = arith.constant 0 : i32
    %c0_i32_0 = arith.constant 0 : i32
    return %arg0, %c0_i32 : i32, i32
  }
}

</mosaic_0001>

<bundles_post_ra>
// kernel: tpu_custom_call.1
= control target key start
LH: loop header
LB: loop body
LE: loop exit
PB: predicated region body
PF: predicated region fallthrough
CT: control target
= control target key end

     0   :  { %8 = vsyncpa [#allocation3], 0  ;;  %s187_s0 = inlined_call_operand.hbm [shape: f32[16,128], index: 0, kind: input, shape index: {}]   ;;  %s188_s1 = inlined_call_operand.vmem [shape: f32[1,128], index: 1, kind: input, shape index: {}]   ;;  %s189_s2 = inlined_call_operand.vmem [shape: f32[1,128], index: 2, kind: input, shape index: {}]   ;;  %s190_s3 = inlined_call_operand.hbm [shape: f32[16,128], index: 3, kind: output, shape index: {}]  }
   0x1   :  { %9 = vsyncpa [#allocation4], 0  ;;  %s145_s12 = smov [#allocation2]  }
   0x2   :  { %s15_s13 = sshll.u32 %s145_s12, 4  ;;  %s16_s13 = int_to_ptr.vmem [resolvable:$true] %s15_s13 }
   0x3   :  { %s109_s14 = scalar_lea.vmem %s16_s13, 256  ;;  %p114_p1 = scmp.lt.s32.totalorder %s16_s13, %s16_s13 }
   0x4   :  { %p110_p0 = scmp.ne.s32.totalorder %s16_s13, %s109_s14  ;;  %p115_p2 = scmp.lt.s32.totalorder %s109_s14, %s109_s14 }
   0x6   :  { %p116_p3 = por %p115_p2, %p114_p1 }
   0x8   :  { %p117_p4 = pnand %p116_p3, %p110_p0 }
   0xa   :  { %120 = shalt.err (!%p117_p4)
}
   0xb   :  { %s146_s15 = smov 128   ;;  %s147_s16 = smov 8  }
   0xc   :  { %21 = dma.hbm_to_vmem [thread:$0]  %s187_s0, 256, %s16_s13, [#allocation3], %s146_s15, %s146_s15, %s147_s16  }
   0xd   :  { %141 = dma.done.wait [#allocation3], 256  }
   0xe   :  { %142 = vsyncadd [#allocation3], 4294967040  ;;  %v29_v0 = vld [vmem:[#allocation2] sm:$0xff]  ;;  %v30_v1 = vld [vmem:[#allocation2 + $0x8] sm:$0xff]  ;;  %s148_s22 = smov [#allocation5]  }
   0xf   :  { %31 = vadd.xlane.f32.xlu0 %v29_v0  ;;  %v91_v17 = vld [vmem:[%s188_s1] ss:$0 sm:$0xff]  ;;  %s79_s23 = sshll.u32 %s148_s22, 4  ;;  %s80_s23 = int_to_ptr.vmem [resolvable:$true] %s79_s23 }
  0x10   :  { %v92_v19 = vld [vmem:[%s189_s2] ss:$0 sm:$0xff]  ;;  %s121_s24 = scalar_lea.vmem %s80_s23, 256  ;;  %p126_p6 = scmp.lt.s32.totalorder %s80_s23, %s80_s23 }
  0x11   :  { %p122_p5 = scmp.ne.s32.totalorder %s80_s23, %s121_s24  ;;  %p127_p7 = scmp.lt.s32.totalorder %s121_s24, %s121_s24 }
  0x13   :  { %33 = vadd.xlane.f32.xlu0 %v30_v1  ;;  %p128_p8 = por %p127_p7, %p126_p6 }
  0x15   :  { %p129_p9 = pnand %p128_p8, %p122_p5 }
  0x98   :  { %v32_v2 = vpop.xlane.xlu0 %31 }
  0x99   :  { %v36_v3 = vmul.f32 0.0078125, %v32_v2 }
  0x9b   :  { %v38_v4 = vsub.f32 %v29_v0, %v36_v3 }
  0x9c   :  { %v34_v5 = vpop.xlane.xlu0 %33 }
  0x9d   :  { %v37_v6 = vmul.f32 0.0078125, %v34_v5  ;;  %v40_v7 = vmul.f32 %v38_v4, %v38_v4 }
  0x9f   :  { %v39_v8 = vsub.f32 %v30_v1, %v37_v6  ;;  %42 = vadd.xlane.f32.xlu1 %v40_v7 }
  0xa1   :  { %v41_v9 = vmul.f32 %v39_v8, %v39_v8 }
  0xa3   :  { %44 = vadd.xlane.f32.xlu1 %v41_v9 }
 0x128   :  { %v43_v10 = vpop.xlane.xlu1 %42 }
 0x129   :  { %v46_v11 = vmul.f32 0.0078125, %v43_v10 }
 0x12b   :  { %v48_v12 = vadd.f32 1e-12, %v46_v11 }
 0x12c   :  { %v45_v13 = vpop.xlane.xlu1 %44 }
 0x12d   :  { %97 = vrsqrt.f32 %v48_v12  ;;  %v47_v14 = vmul.f32 0.0078125, %v45_v13 }
 0x12f   :  { %v49_v15 = vadd.f32 1e-12, %v47_v14 }
 0x131   :  { %99 = vrsqrt.f32 %v49_v15 }
 0x13a   :  { %v98_v16 = vpop.eup %97 }
 0x13b   :  { %v52_v18 = vmul.f32 %v98_v16, %v38_v4 }
 0x13d   :  { %v61_v20 = vmul.f32 %v91_v17, %v52_v18 }
 0x13e   :  { %v100_v21 = vpop.eup %99 }
 0x13f   :  { %v53_v22 = vmul.f32 %v100_v21, %v39_v8  ;;  %v70_v23 = vadd.f32 %v92_v19, %v61_v20 }
 0x141   :  { %v62_v24 = vmul.f32 %v91_v17, %v53_v22  ;;  %72 = vst [vmem:[#allocation5] sm:$0xff] %v70_v23 }
 0x143   :  { %v71_v25 = vadd.f32 %v92_v19, %v62_v24 }
 0x145   :  { %73 = vst [vmem:[#allocation5 + $0x8] sm:$0xff] %v71_v25 }
 0x146   :  { %132 = shalt.err (!%p129_p9)
}
 0x147   :  { %85 = dma.vmem_to_hbm [thread:$0]  %s80_s23, 256, %s190_s3, [#allocation4], %s146_s15, %s146_s15, %s147_s16  }
 0x148   :  { %143 = dma.done.wait [#allocation4], 256  }
 0x149   :  { %144 = vsyncadd [#allocation4], 4294967040 }
 0x14a   :  { %89 = vsyncpa [#allocation3], 1 }
 0x14b   :  { %90 = vsyncpa [#allocation4], 1 }

</bundles_post_ra>
